<compile_context>
chip_gen: v6e
topology: v6e:2x2x1
jax: 0.10.0
libtpu: 0.0.40
codegen_flags: <defaults>
</compile_context>

<pallas_src>
import math

import jax
import jax.numpy as jnp
from jax.experimental import pallas as pl
from jax.experimental.pallas import tpu as pltpu

# ----- mini-BERT config (small-scale stand-in for bert-base-cased) -----
VOCAB = 100
MAX_POS = 32
TYPE_VOCAB = 2
HIDDEN = 32
N_HEADS = 2
HEAD_DIM = HIDDEN // N_HEADS
FFN = 64
N_LAYERS = 2
N_CLASSES = 3
LN_EPS = 1e-12
LOGIT_PAD = 128  # lane-dense padded logits width


# ------------------------------ in-kernel helpers ------------------------------

def _layernorm(x, g, b):
    mean = jnp.mean(x, axis=-1, keepdims=True)
    cen = x - mean
    var = jnp.mean(cen * cen, axis=-1, keepdims=True)
    return cen * jax.lax.rsqrt(var + LN_EPS) * g + b


def _gelu(x):
    # TODO(synk): HF bert-base-cased uses the exact erf GELU; the tanh
    # approximation differs ~1e-3 rel. Kept in f32 (v5e has no bf16 VPU/EUP).
    c = math.sqrt(2.0 / math.pi)
    return 0.5 * x * (1.0 + jnp.tanh(c * (x + 0.044715 * x * x * x)))


# ------------------------------ fused Pallas kernel ------------------------------

def _fused_bert_kernel(emb_ref, bias_ref, embg_ref, embb_ref,
                       wqkv_ref, bqkv_ref, wo_ref, bo_ref,
                       ln1g_ref, ln1b_ref, w1_ref, b1_ref, w2_ref, b2_ref,
                       ln2g_ref, ln2b_ref,
                       pw_ref, pb_ref, ow_ref, ob_ref,
                       logits_ref, h_scr):
    """grid = (batch, layer); layer is the innermost, sequential ("arbitrary") axis.

    The hidden state lives in the VMEM scratch `h_scr` across the layer axis:
    it is (re)initialized from the embedding LayerNorm at layer 0 of every batch
    element, updated in place per layer, and only the final lane-dense padded
    logits block ever reaches HBM."""
    l = pl.program_id(1)

    @pl.when(l == 0)
    def _():  # embedding LayerNorm -> resident hidden state
        h_scr[...] = _layernorm(emb_ref[0], embg_ref[...], embb_ref[...])

    h = h_scr[...]                                   # (S, H)  f32
    bias = bias_ref[0]                               # (1, S)  precomputed -10000*(1-mask)

    # fused QKV projection: one wide MXU pass, bf16 operands, f32 accumulation
    qkv = jnp.dot(h.astype(jnp.bfloat16), wqkv_ref[0],
                  preferred_element_type=jnp.float32) + bqkv_ref[0]   # (S, 3H)

    # TODO(synk): at real bert-base shapes move the head split to the
    # sublane/leading axis ((nH, S, Dh) stacked) to avoid 16-lane slices.
    scale = 1.0 / math.sqrt(HEAD_DIM)
    ctx_heads = []
    for hd in range(N_HEADS):
        lo = hd * HEAD_DIM
        q = qkv[:, lo:lo + HEAD_DIM]                                   # (S, Dh)
        k = qkv[:, HIDDEN + lo:HIDDEN + lo + HEAD_DIM]                 # (S, Dh)
        v = qkv[:, 2 * HIDDEN + lo:2 * HIDDEN + lo + HEAD_DIM]         # (S, Dh)
        s = jax.lax.dot_general(q.astype(jnp.bfloat16), k.astype(jnp.bfloat16),
                                (((1,), (1,)), ((), ())),
                                preferred_element_type=jnp.float32)    # (S, S)
        s = s * scale + bias
        m = jnp.max(s, axis=-1, keepdims=True)
        p = jnp.exp(s - m)
        den = jnp.sum(p, axis=-1, keepdims=True)
        p = p * pl.reciprocal(den, approx=True)                        # EUP slot
        ctx_heads.append(jnp.dot(p.astype(jnp.bfloat16), v.astype(jnp.bfloat16),
                                 preferred_element_type=jnp.float32))  # (S, Dh)

    # single output projection over all heads (one MXU pass, no per-head adds)
    ctx = jnp.concatenate(ctx_heads, axis=-1)                          # (S, H)
    attn = jnp.dot(ctx.astype(jnp.bfloat16), wo_ref[0],
                   preferred_element_type=jnp.float32) + bo_ref[0]

    # residual + LayerNorm 1 (f32)
    h1 = _layernorm(attn + h, ln1g_ref[0], ln1b_ref[0])

    # FFN: GELU(h1 @ W1 + b1) @ W2 + b2, bf16 MXU operands, f32 elementwise
    ff = jnp.dot(h1.astype(jnp.bfloat16), w1_ref[0],
                 preferred_element_type=jnp.float32) + b1_ref[0]
    ff = _gelu(ff)
    ff = jnp.dot(ff.astype(jnp.bfloat16), w2_ref[0],
                 preferred_element_type=jnp.float32) + b2_ref[0]

    # residual + LayerNorm 2 -> keep resident for the next layer
    h_out = _layernorm(ff + h1, ln2g_ref[0], ln2b_ref[0])
    h_scr[...] = h_out

    # last layer: fused pooler (tanh Linear on [CLS]) + Dropout(eval)=identity
    # + classifier into a lane-dense padded logits block.
    # TODO(synk): train-mode stochastic dropout (pltpu.prng_*) not implemented.
    @pl.when(l == pl.num_programs(1) - 1)
    def _():
        cls = h_out[0:1, :]                                            # (1, H)
        pooled = jnp.tanh(jnp.dot(cls.astype(jnp.bfloat16), pw_ref[...],
                                  preferred_element_type=jnp.float32) + pb_ref[...])
        logits_ref[0] = jnp.dot(pooled.astype(jnp.bfloat16), ow_ref[...],
                                preferred_element_type=jnp.float32) + ob_ref[...]


# ------------------------------ kernel wrapper ------------------------------

def fused_bert_forward(emb, bias, p):
    """emb: (B, S, H) f32 pre-LN embeddings, bias: (B, 1, S) f32 additive mask bias.
    Returns padded logits (B, 1, LOGIT_PAD). One pallas_call for the whole model."""
    B, S, H = emb.shape
    L = N_LAYERS

    perb = lambda shape: pl.BlockSpec(shape, lambda b, l: (b, 0, 0))   # per-batch block
    perl = lambda shape: pl.BlockSpec(shape, lambda b, l: (l, 0, 0))   # per-layer stacked weight
    cst2 = lambda shape: pl.BlockSpec(shape, lambda b, l: (0, 0))      # grid-constant 2-D

    operands = (emb, bias, p["emb_ln_g"], p["emb_ln_b"],
                p["wqkv"], p["bqkv"], p["wo"], p["bo"],
                p["ln1_g"], p["ln1_b"], p["w1"], p["b1"], p["w2"], p["b2"],
                p["ln2_g"], p["ln2_b"],
                p["pooler_w"], p["pooler_b"], p["out_w"], p["out_b"])

    in_specs = [
        perb((1, S, H)),                              # pre-LN embeddings
        perb((1, 1, S)),                              # additive attention bias
        cst2((1, H)), cst2((1, H)),                   # embedding LN gamma/beta
        perl((1, H, 3 * H)), perl((1, 1, 3 * H)),     # fused Wqkv (bf16) / bqkv
        perl((1, H, H)), perl((1, 1, H)),             # Wo (bf16) / bo
        perl((1, 1, H)), perl((1, 1, H)),             # ln1 gamma/beta
        perl((1, H, FFN)), perl((1, 1, FFN)),         # W1 (bf16) / b1
        perl((1, FFN, H)), perl((1, 1, H)),           # W2 (bf16) / b2
        perl((1, 1, H)), perl((1, 1, H)),             # ln2 gamma/beta
        cst2((H, H)), cst2((1, H)),                   # pooler (bf16) / bias
        cst2((H, LOGIT_PAD)), cst2((1, LOGIT_PAD)),   # classifier (lane-dense padded)
    ]

    # Advisory cost estimate so XLA can overlap the embedding gathers with this call.
    per_layer_flops = (2 * S * H * 3 * H              # QKV projection
                       + 4 * S * S * H                # scores + context (all heads)
                       + 2 * S * H * H                # output projection
                       + 4 * S * H * FFN)             # FFN in + out
    flops = B * (L * per_layer_flops + 2 * H * H + 2 * H * LOGIT_PAD)
    transcendentals = B * (L * (N_HEADS * S * S + S * FFN + 2 * S) + H)
    bytes_accessed = (sum(int(x.size) * x.dtype.itemsize for x in operands)
                      + B * LOGIT_PAD * 4)

    return pl.pallas_call(
        _fused_bert_kernel,
        out_shape=jax.ShapeDtypeStruct((B, 1, LOGIT_PAD), jnp.float32),
        grid=(B, L),
        in_specs=in_specs,
        out_specs=pl.BlockSpec((1, 1, LOGIT_PAD), lambda b, l: (b, 0, 0)),
        scratch_shapes=[pltpu.VMEM((S, H), jnp.float32)],   # resident hidden state
        compiler_params=pltpu.CompilerParams(
            dimension_semantics=("parallel", "arbitrary"),
            vmem_limit_bytes=32 * 1024 * 1024),
        cost_estimate=pl.CostEstimate(flops=flops,
                                      transcendentals=transcendentals,
                                      bytes_accessed=bytes_accessed),
    )(*operands)


# ------------------------------ model / params ------------------------------

def init_params(key):
    def dense(k, fan_in, fan_out):
        kw, kb = jax.random.split(k)
        w = jax.random.normal(kw, (fan_in, fan_out), jnp.float32) * 0.02
        b = jax.random.normal(kb, (fan_out,), jnp.float32) * 0.02
        return w, b

    keys = jax.random.split(key, 5 + N_LAYERS)
    params = {
        "word_emb": jax.random.normal(keys[0], (VOCAB, HIDDEN), jnp.float32) * 0.02,
        "pos_emb": jax.random.normal(keys[1], (MAX_POS, HIDDEN), jnp.float32) * 0.02,
        "type_emb": jax.random.normal(keys[2], (TYPE_VOCAB, HIDDEN), jnp.float32) * 0.02,
        "emb_ln_g": jnp.ones((HIDDEN,), jnp.float32),
        "emb_ln_b": jnp.zeros((HIDDEN,), jnp.float32),
    }
    layers = []
    for li in range(N_LAYERS):
        lk = jax.random.split(keys[3 + li], 6)
        wq, bq = dense(lk[0], HIDDEN, HIDDEN)
        wk, bk = dense(lk[1], HIDDEN, HIDDEN)
        wv, bv = dense(lk[2], HIDDEN, HIDDEN)
        wo, bo = dense(lk[3], HIDDEN, HIDDEN)
        w1, b1 = dense(lk[4], HIDDEN, FFN)
        w2, b2 = dense(lk[5], FFN, HIDDEN)
        layers.append(dict(
            wq=wq, bq=bq, wk=wk, bk=bk, wv=wv, bv=bv, wo=wo, bo=bo,
            w1=w1, b1=b1, w2=w2, b2=b2,
            ln1_g=jnp.ones((HIDDEN,), jnp.float32),
            ln1_b=jnp.zeros((HIDDEN,), jnp.float32),
            ln2_g=jnp.ones((HIDDEN,), jnp.float32),
            ln2_b=jnp.zeros((HIDDEN,), jnp.float32),
        ))
    params["layers"] = layers
    params["pooler_w"], params["pooler_b"] = dense(keys[3 + N_LAYERS], HIDDEN, HIDDEN)
    params["out_w"], params["out_b"] = dense(keys[4 + N_LAYERS], HIDDEN, N_CLASSES)
    return params


def preprocess_params(params):
    """One-time weight prep: fuse Wq|Wk|Wv, cast MXU weights to bf16, reshape
    biases/LN params to (1,N), stack per-layer weights along a leading
    (N_LAYERS, ...) axis (indexed by the layer grid axis), and zero-pad the
    classifier to a lane-dense 128-wide block."""
    bf = lambda x: x.astype(jnp.bfloat16)
    L = params["layers"]
    proc = {
        "word_emb": params["word_emb"],
        "pos_emb": params["pos_emb"],
        "type_emb": params["type_emb"],
        "emb_ln_g": params["emb_ln_g"].reshape(1, HIDDEN),
        "emb_ln_b": params["emb_ln_b"].reshape(1, HIDDEN),
        "pooler_w": bf(params["pooler_w"]),
        "pooler_b": params["pooler_b"].reshape(1, HIDDEN),
        "out_w": bf(jnp.zeros((HIDDEN, LOGIT_PAD), jnp.float32)
                    .at[:, :N_CLASSES].set(params["out_w"])),
        "out_b": jnp.zeros((1, LOGIT_PAD), jnp.float32)
                   .at[:, :N_CLASSES].set(params["out_b"]),
    }
    # per-layer weights stacked so one pallas_call indexes them with (l, 0, 0)
    proc["wqkv"] = bf(jnp.stack(
        [jnp.concatenate([p["wq"], p["wk"], p["wv"]], axis=1) for p in L]))      # (L,H,3H)
    proc["bqkv"] = jnp.stack(
        [jnp.concatenate([p["bq"], p["bk"], p["bv"]]).reshape(1, 3 * HIDDEN) for p in L])
    proc["wo"] = bf(jnp.stack([p["wo"] for p in L]))
    proc["bo"] = jnp.stack([p["bo"].reshape(1, HIDDEN) for p in L])
    proc["ln1_g"] = jnp.stack([p["ln1_g"].reshape(1, HIDDEN) for p in L])
    proc["ln1_b"] = jnp.stack([p["ln1_b"].reshape(1, HIDDEN) for p in L])
    proc["w1"] = bf(jnp.stack([p["w1"] for p in L]))
    proc["b1"] = jnp.stack([p["b1"].reshape(1, FFN) for p in L])
    proc["w2"] = bf(jnp.stack([p["w2"] for p in L]))
    proc["b2"] = jnp.stack([p["b2"].reshape(1, HIDDEN) for p in L])
    proc["ln2_g"] = jnp.stack([p["ln2_g"].reshape(1, HIDDEN) for p in L])
    proc["ln2_b"] = jnp.stack([p["ln2_b"].reshape(1, HIDDEN) for p in L])
    return proc


def category_classifier_forward(params, input_ids, attention_mask):
    """input_ids, attention_mask: (B, S) int32.  Returns logits (B, n_classes)."""
    B, S = input_ids.shape
    assert S <= MAX_POS

    # BERT embeddings (gathers are plain-JAX glue); LN happens inside the fused kernel.
    word = params["word_emb"][input_ids]                       # (B, S, H)
    pos = params["pos_emb"][jnp.arange(S)][None, :, :]         # (1, S, H)
    typ = params["type_emb"][0][None, None, :]                 # token_type_ids == 0
    emb = word + pos + typ                                     # (B, S, H)

    # additive attention bias precomputed ONCE (hoisted out of the kernel);
    # still no dense (B, H, S, S) tensor is ever materialized.
    bias = (1.0 - attention_mask.astype(jnp.float32)).reshape(B, 1, S) * -10000.0

    logits_padded = fused_bert_forward(emb, bias, params)      # (B, 1, LOGIT_PAD)
    return logits_padded[:, 0, :N_CLASSES]


if __name__ == "__main__":
    key = jax.random.PRNGKey(0)
    kp, kid = jax.random.split(key)
    params = preprocess_params(init_params(kp))

    B, S = 2, 8
    input_ids = jax.random.randint(kid, (B, S), 0, VOCAB, dtype=jnp.int32)
    attention_mask = jnp.ones((B, S), jnp.int32).at[1, 5:].set(0)

    logits = jax.jit(category_classifier_forward)(params, input_ids, attention_mask)
    jax.block_until_ready(logits)

    assert logits.shape == (B, N_CLASSES)
    assert bool(jnp.all(jnp.isfinite(logits)))
    print("KERNEL_OK")
</pallas_src>

<mosaic_0001>
module attributes {stable_mosaic.version = 11 : i64} {
  func.func @_fused_bert_kernel(%arg0: i32, %arg1: i32, %arg2: memref<1x8x32xf32, #tpu.memory_space<vmem>>, %arg3: memref<1x1x8xf32, #tpu.memory_space<vmem>>, %arg4: memref<1x32xf32, #tpu.memory_space<vmem>>, %arg5: memref<1x32xf32, #tpu.memory_space<vmem>>, %arg6: memref<1x32x96xbf16, #tpu.memory_space<vmem>>, %arg7: memref<1x1x96xf32, #tpu.memory_space<vmem>>, %arg8: memref<1x32x32xbf16, #tpu.memory_space<vmem>>, %arg9: memref<1x1x32xf32, #tpu.memory_space<vmem>>, %arg10: memref<1x1x32xf32, #tpu.memory_space<vmem>>, %arg11: memref<1x1x32xf32, #tpu.memory_space<vmem>>, %arg12: memref<1x32x64xbf16, #tpu.memory_space<vmem>>, %arg13: memref<1x1x64xf32, #tpu.memory_space<vmem>>, %arg14: memref<1x64x32xbf16, #tpu.memory_space<vmem>>, %arg15: memref<1x1x32xf32, #tpu.memory_space<vmem>>, %arg16: memref<1x1x32xf32, #tpu.memory_space<vmem>>, %arg17: memref<1x1x32xf32, #tpu.memory_space<vmem>>, %arg18: memref<32x32xbf16, #tpu.memory_space<vmem>>, %arg19: memref<1x32xf32, #tpu.memory_space<vmem>>, %arg20: memref<32x128xbf16, #tpu.memory_space<vmem>>, %arg21: memref<1x128xf32, #tpu.memory_space<vmem>>, %arg22: memref<1x1x128xf32, #tpu.memory_space<vmem>>, %arg23: memref<8x32xf32, #tpu.memory_space<vmem>>) attributes {dimension_semantics = [#tpu.dimension_semantics<parallel>, #tpu.dimension_semantics<arbitrary>], iteration_bounds = array<i64: 2, 2>, scalar_prefetch = 0 : i64, scratch_operands = 1 : i64, tpu.core_type = #tpu.core_type<tc>, window_params = [{transform_indices = @transform_0, window_bounds = array<i64: 1, 8, 32>}, {transform_indices = @transform_1, window_bounds = array<i64: 1, 1, 8>}, {pipeline_mode = #tpu.pipeline_mode<synchronous>, transform_indices = @transform_2, window_bounds = array<i64: 1, 32>}, {pipeline_mode = #tpu.pipeline_mode<synchronous>, transform_indices = @transform_3, window_bounds = array<i64: 1, 32>}, {transform_indices = @transform_4, window_bounds = array<i64: 1, 32, 96>}, {transform_indices = @transform_5, window_bounds = array<i64: 1, 1, 96>}, {transform_indices = @transform_6, window_bounds = array<i64: 1, 32, 32>}, {transform_indices = @transform_7, window_bounds = array<i64: 1, 1, 32>}, {transform_indices = @transform_8, window_bounds = array<i64: 1, 1, 32>}, {transform_indices = @transform_9, window_bounds = array<i64: 1, 1, 32>}, {transform_indices = @transform_10, window_bounds = array<i64: 1, 32, 64>}, {transform_indices = @transform_11, window_bounds = array<i64: 1, 1, 64>}, {transform_indices = @transform_12, window_bounds = array<i64: 1, 64, 32>}, {transform_indices = @transform_13, window_bounds = array<i64: 1, 1, 32>}, {transform_indices = @transform_14, window_bounds = array<i64: 1, 1, 32>}, {transform_indices = @transform_15, window_bounds = array<i64: 1, 1, 32>}, {pipeline_mode = #tpu.pipeline_mode<synchronous>, transform_indices = @transform_16, window_bounds = array<i64: 32, 32>}, {pipeline_mode = #tpu.pipeline_mode<synchronous>, transform_indices = @transform_17, window_bounds = array<i64: 1, 32>}, {pipeline_mode = #tpu.pipeline_mode<synchronous>, transform_indices = @transform_18, window_bounds = array<i64: 32, 128>}, {pipeline_mode = #tpu.pipeline_mode<synchronous>, transform_indices = @transform_19, window_bounds = array<i64: 1, 128>}, {transform_indices = @transform_20, window_bounds = array<i64: 1, 1, 128>}]} {
    %c0_i32 = arith.constant 0 : i32
    %0 = arith.cmpi eq, %arg1, %c0_i32 : i32
    %1 = arith.extui %0 : i1 to i32
    %c0_i32_0 = arith.constant 0 : i32
    %2 = arith.cmpi ne, %1, %c0_i32_0 : i32
    scf.if %2 {
      %c0_71 = arith.constant 0 : index
      %c0_72 = arith.constant 0 : index
      %c0_73 = arith.constant 0 : index
      %152 = vector.load %arg2[%c0_71, %c0_72, %c0_73] : memref<1x8x32xf32, #tpu.memory_space<vmem>>, vector<1x8x32xf32>
      %153 = vector.shape_cast %152 : vector<1x8x32xf32> to vector<8x32xf32>
      %c0_74 = arith.constant 0 : index
      %c0_75 = arith.constant 0 : index
      %154 = vector.load %arg4[%c0_74, %c0_75] : memref<1x32xf32, #tpu.memory_space<vmem>>, vector<1x32xf32>
      %c0_76 = arith.constant 0 : index
      %c0_77 = arith.constant 0 : index
      %155 = vector.load %arg5[%c0_76, %c0_77] : memref<1x32xf32, #tpu.memory_space<vmem>>, vector<1x32xf32>
      %cst_78 = arith.constant dense<0.000000e+00> : vector<8xf32>
      %156 = vector.multi_reduction <add>, %153, %cst_78 [1] : vector<8x32xf32> to vector<8xf32>
      %157 = vector.shape_cast %156 : vector<8xf32> to vector<8x1xf32>
      %cst_79 = arith.constant 3.200000e+01 : f32
      %158 = vector.broadcast %cst_79 : f32 to vector<8x1xf32>
      %159 = arith.divf %157, %158 : vector<8x1xf32>
      %160 = vector.broadcast %159 : vector<8x1xf32> to vector<8x32xf32>
      %161 = arith.subf %153, %160 : vector<8x32xf32>
      %162 = arith.mulf %161, %161 : vector<8x32xf32>
      %cst_80 = arith.constant dense<0.000000e+00> : vector<8xf32>
      %163 = vector.multi_reduction <add>, %162, %cst_80 [1] : vector<8x32xf32> to vector<8xf32>
      %164 = vector.shape_cast %163 : vector<8xf32> to vector<8x1xf32>
      %cst_81 = arith.constant 3.200000e+01 : f32
      %165 = vector.broadcast %cst_81 : f32 to vector<8x1xf32>
      %166 = arith.divf %164, %165 : vector<8x1xf32>
      %cst_82 = arith.constant 9.99999996E-13 : f32
      %167 = vector.broadcast %cst_82 : f32 to vector<8x1xf32>
      %168 = arith.addf %166, %167 : vector<8x1xf32>
      %169 = math.rsqrt %168 : vector<8x1xf32>
      %170 = vector.broadcast %169 : vector<8x1xf32> to vector<8x32xf32>
      %171 = arith.mulf %161, %170 : vector<8x32xf32>
      %172 = vector.broadcast %154 : vector<1x32xf32> to vector<8x32xf32>
      %173 = arith.mulf %171, %172 : vector<8x32xf32>
      %174 = vector.broadcast %155 : vector<1x32xf32> to vector<8x32xf32>
      %175 = arith.addf %173, %174 : vector<8x32xf32>
      %c0_83 = arith.constant 0 : index
      %c0_84 = arith.constant 0 : index
      %176 = vector.load %arg23[%c0_83, %c0_84] : memref<8x32xf32, #tpu.memory_space<vmem>>, vector<8x32xf32>
      tpu.vector_store %arg23[%c0_83, %c0_84], %175 {strides = array<i32>} : memref<8x32xf32, #tpu.memory_space<vmem>>, vector<8x32xf32>,
    } else {
    }
    %c0 = arith.constant 0 : index
    %c0_1 = arith.constant 0 : index
    %3 = vector.load %arg23[%c0, %c0_1] : memref<8x32xf32, #tpu.memory_space<vmem>>, vector<8x32xf32>
    %c0_2 = arith.constant 0 : index
    %c0_3 = arith.constant 0 : index
    %c0_4 = arith.constant 0 : index
    %4 = vector.load %arg3[%c0_2, %c0_3, %c0_4] : memref<1x1x8xf32, #tpu.memory_space<vmem>>, vector<1x1x8xf32>
    %5 = vector.shape_cast %4 : vector<1x1x8xf32> to vector<1x8xf32>
    %6 = arith.truncf %3 : vector<8x32xf32> to vector<8x32xbf16>
    %c0_5 = arith.constant 0 : index
    %c0_6 = arith.constant 0 : index
    %c0_7 = arith.constant 0 : index
    %7 = vector.load %arg6[%c0_5, %c0_6, %c0_7] : memref<1x32x96xbf16, #tpu.memory_space<vmem>>, vector<1x32x96xbf16>
    %8 = vector.shape_cast %7 : vector<1x32x96xbf16> to vector<32x96xbf16>
    %cst = arith.constant dense<0.000000e+00> : vector<8x96xf32>
    %9 = tpu.matmul %6, %8, %cst {dimension_numbers = #tpu.dot_dimension_numbers<[1], [0], [0], [1], [0, 0, 1, 1], [], []>} : vector<8x32xbf16>, vector<32x96xbf16>, vector<8x96xf32> -> vector<8x96xf32>
    %c0_8 = arith.constant 0 : index
    %c0_9 = arith.constant 0 : index
    %c0_10 = arith.constant 0 : index
    %10 = vector.load %arg7[%c0_8, %c0_9, %c0_10] : memref<1x1x96xf32, #tpu.memory_space<vmem>>, vector<1x1x96xf32>
    %11 = vector.shape_cast %10 : vector<1x1x96xf32> to vector<1x96xf32>
    %12 = vector.broadcast %11 : vector<1x96xf32> to vector<8x96xf32>
    %13 = arith.addf %9, %12 : vector<8x96xf32>
    %14 = vector.extract_strided_slice %13 {offsets = [0, 0], sizes = [8, 16], strides = [1, 1]} : vector<8x96xf32> to vector<8x16xf32>
    %15 = vector.extract_strided_slice %13 {offsets = [0, 32], sizes = [8, 16], strides = [1, 1]} : vector<8x96xf32> to vector<8x16xf32>
    %16 = vector.extract_strided_slice %13 {offsets = [0, 64], sizes = [8, 16], strides = [1, 1]} : vector<8x96xf32> to vector<8x16xf32>
    %17 = arith.truncf %14 : vector<8x16xf32> to vector<8x16xbf16>
    %18 = arith.truncf %15 : vector<8x16xf32> to vector<8x16xbf16>
    %cst_11 = arith.constant dense<0.000000e+00> : vector<8x8xf32>
    %19 = tpu.matmul %17, %18, %cst_11 {dimension_numbers = #tpu.dot_dimension_numbers<[1], [1], [0], [0], [0, 0, 1, 0], [], []>} : vector<8x16xbf16>, vector<8x16xbf16>, vector<8x8xf32> -> vector<8x8xf32>
    %cst_12 = arith.constant 2.500000e-01 : f32
    %20 = vector.broadcast %cst_12 : f32 to vector<8x8xf32>
    %21 = arith.mulf %19, %20 : vector<8x8xf32>
    %22 = vector.broadcast %5 : vector<1x8xf32> to vector<8x8xf32>
    %23 = arith.addf %21, %22 : vector<8x8xf32>
    %cst_13 = arith.constant dense<0xFF800000> : vector<8xf32>
    %24 = vector.multi_reduction <maximumf>, %23, %cst_13 [1] : vector<8x8xf32> to vector<8xf32>
    %25 = vector.shape_cast %24 : vector<8xf32> to vector<8x1xf32>
    %26 = vector.broadcast %25 : vector<8x1xf32> to vector<8x8xf32>
    %27 = arith.subf %23, %26 : vector<8x8xf32>
    %28 = math.exp %27 : vector<8x8xf32>
    %cst_14 = arith.constant dense<0.000000e+00> : vector<8xf32>
    %29 = vector.multi_reduction <add>, %28, %cst_14 [1] : vector<8x8xf32> to vector<8xf32>
    %30 = vector.shape_cast %29 : vector<8xf32> to vector<8x1xf32>
    %31 = tpu.reciprocal %30 {approx = true} : vector<8x1xf32> -> vector<8x1xf32>
    %32 = vector.broadcast %31 : vector<8x1xf32> to vector<8x8xf32>
    %33 = arith.mulf %28, %32 : vector<8x8xf32>
    %34 = arith.truncf %33 : vector<8x8xf32> to vector<8x8xbf16>
    %35 = arith.truncf %16 : vector<8x16xf32> to vector<8x16xbf16>
    %cst_15 = arith.constant dense<0.000000e+00> : vector<8x16xf32>
    %36 = tpu.matmul %34, %35, %cst_15 {dimension_numbers = #tpu.dot_dimension_numbers<[1], [0], [0], [1], [0, 0, 1, 1], [], []>} : vector<8x8xbf16>, vector<8x16xbf16>, vector<8x16xf32> -> vector<8x16xf32>
    %37 = vector.extract_strided_slice %13 {offsets = [0, 16], sizes = [8, 16], strides = [1, 1]} : vector<8x96xf32> to vector<8x16xf32>
    %38 = vector.extract_strided_slice %13 {offsets = [0, 48], sizes = [8, 16], strides = [1, 1]} : vector<8x96xf32> to vector<8x16xf32>
    %39 = vector.extract_strided_slice %13 {offsets = [0, 80], sizes = [8, 16], strides = [1, 1]} : vector<8x96xf32> to vector<8x16xf32>
    %40 = arith.truncf %37 : vector<8x16xf32> to vector<8x16xbf16>
    %41 = arith.truncf %38 : vector<8x16xf32> to vector<8x16xbf16>
    %cst_16 = arith.constant dense<0.000000e+00> : vector<8x8xf32>
    %42 = tpu.matmul %40, %41, %cst_16 {dimension_numbers = #tpu.dot_dimension_numbers<[1], [1], [0], [0], [0, 0, 1, 0], [], []>} : vector<8x16xbf16>, vector<8x16xbf16>, vector<8x8xf32> -> vector<8x8xf32>
    %cst_17 = arith.constant 2.500000e-01 : f32
    %43 = vector.broadcast %cst_17 : f32 to vector<8x8xf32>
    %44 = arith.mulf %42, %43 : vector<8x8xf32>
    %45 = vector.broadcast %5 : vector<1x8xf32> to vector<8x8xf32>
    %46 = arith.addf %44, %45 : vector<8x8xf32>
    %cst_18 = arith.constant dense<0xFF800000> : vector<8xf32>
    %47 = vector.multi_reduction <maximumf>, %46, %cst_18 [1] : vector<8x8xf32> to vector<8xf32>
    %48 = vector.shape_cast %47 : vector<8xf32> to vector<8x1xf32>
    %49 = vector.broadcast %48 : vector<8x1xf32> to vector<8x8xf32>
    %50 = arith.subf %46, %49 : vector<8x8xf32>
    %51 = math.exp %50 : vector<8x8xf32>
    %cst_19 = arith.constant dense<0.000000e+00> : vector<8xf32>
    %52 = vector.multi_reduction <add>, %51, %cst_19 [1] : vector<8x8xf32> to vector<8xf32>
    %53 = vector.shape_cast %52 : vector<8xf32> to vector<8x1xf32>
    %54 = tpu.reciprocal %53 {approx = true} : vector<8x1xf32> -> vector<8x1xf32>
    %55 = vector.broadcast %54 : vector<8x1xf32> to vector<8x8xf32>
    %56 = arith.mulf %51, %55 : vector<8x8xf32>
    %57 = arith.truncf %56 : vector<8x8xf32> to vector<8x8xbf16>
    %58 = arith.truncf %39 : vector<8x16xf32> to vector<8x16xbf16>
    %cst_20 = arith.constant dense<0.000000e+00> : vector<8x16xf32>
    %59 = tpu.matmul %57, %58, %cst_20 {dimension_numbers = #tpu.dot_dimension_numbers<[1], [0], [0], [1], [0, 0, 1, 1], [], []>} : vector<8x8xbf16>, vector<8x16xbf16>, vector<8x16xf32> -> vector<8x16xf32>
    %60 = tpu.concatenate %36, %59 in 1 : vector<8x16xf32>, vector<8x16xf32> -> vector<8x32xf32>
    %61 = arith.truncf %60 : vector<8x32xf32> to vector<8x32xbf16>
    %c0_21 = arith.constant 0 : index
    %c0_22 = arith.constant 0 : index
    %c0_23 = arith.constant 0 : index
    %62 = vector.load %arg8[%c0_21, %c0_22, %c0_23] : memref<1x32x32xbf16, #tpu.memory_space<vmem>>, vector<1x32x32xbf16>
    %63 = vector.shape_cast %62 : vector<1x32x32xbf16> to vector<32x32xbf16>
    %cst_24 = arith.constant dense<0.000000e+00> : vector<8x32xf32>
    %64 = tpu.matmul %61, %63, %cst_24 {dimension_numbers = #tpu.dot_dimension_numbers<[1], [0], [0], [1], [0, 0, 1, 1], [], []>} : vector<8x32xbf16>, vector<32x32xbf16>, vector<8x32xf32> -> vector<8x32xf32>
    %c0_25 = arith.constant 0 : index
    %c0_26 = arith.constant 0 : index
    %c0_27 = arith.constant 0 : index
    %65 = vector.load %arg9[%c0_25, %c0_26, %c0_27] : memref<1x1x32xf32, #tpu.memory_space<vmem>>, vector<1x1x32xf32>
    %66 = vector.shape_cast %65 : vector<1x1x32xf32> to vector<1x32xf32>
    %67 = vector.broadcast %66 : vector<1x32xf32> to vector<8x32xf32>
    %68 = arith.addf %64, %67 : vector<8x32xf32>
    %69 = arith.addf %68, %3 : vector<8x32xf32>
    %c0_28 = arith.constant 0 : index
    %c0_29 = arith.constant 0 : index
    %c0_30 = arith.constant 0 : index
    %70 = vector.load %arg10[%c0_28, %c0_29, %c0_30] : memref<1x1x32xf32, #tpu.memory_space<vmem>>, vector<1x1x32xf32>
    %71 = vector.shape_cast %70 : vector<1x1x32xf32> to vector<1x32xf32>
    %c0_31 = arith.constant 0 : index
    %c0_32 = arith.constant 0 : index
    %c0_33 = arith.constant 0 : index
    %72 = vector.load %arg11[%c0_31, %c0_32, %c0_33] : memref<1x1x32xf32, #tpu.memory_space<vmem>>, vector<1x1x32xf32>
    %73 = vector.shape_cast %72 : vector<1x1x32xf32> to vector<1x32xf32>
    %cst_34 = arith.constant dense<0.000000e+00> : vector<8xf32>
    %74 = vector.multi_reduction <add>, %69, %cst_34 [1] : vector<8x32xf32> to vector<8xf32>
    %75 = vector.shape_cast %74 : vector<8xf32> to vector<8x1xf32>
    %cst_35 = arith.constant 3.200000e+01 : f32
    %76 = vector.broadcast %cst_35 : f32 to vector<8x1xf32>
    %77 = arith.divf %75, %76 : vector<8x1xf32>
    %78 = vector.broadcast %77 : vector<8x1xf32> to vector<8x32xf32>
    %79 = arith.subf %69, %78 : vector<8x32xf32>
    %80 = arith.mulf %79, %79 : vector<8x32xf32>
    %cst_36 = arith.constant dense<0.000000e+00> : vector<8xf32>
    %81 = vector.multi_reduction <add>, %80, %cst_36 [1] : vector<8x32xf32> to vector<8xf32>
    %82 = vector.shape_cast %81 : vector<8xf32> to vector<8x1xf32>
    %cst_37 = arith.constant 3.200000e+01 : f32
    %83 = vector.broadcast %cst_37 : f32 to vector<8x1xf32>
    %84 = arith.divf %82, %83 : vector<8x1xf32>
    %cst_38 = arith.constant 9.99999996E-13 : f32
    %85 = vector.broadcast %cst_38 : f32 to vector<8x1xf32>
    %86 = arith.addf %84, %85 : vector<8x1xf32>
    %87 = math.rsqrt %86 : vector<8x1xf32>
    %88 = vector.broadcast %87 : vector<8x1xf32> to vector<8x32xf32>
    %89 = arith.mulf %79, %88 : vector<8x32xf32>
    %90 = vector.broadcast %71 : vector<1x32xf32> to vector<8x32xf32>
    %91 = arith.mulf %89, %90 : vector<8x32xf32>
    %92 = vector.broadcast %73 : vector<1x32xf32> to vector<8x32xf32>
    %93 = arith.addf %91, %92 : vector<8x32xf32>
    %94 = arith.truncf %93 : vector<8x32xf32> to vector<8x32xbf16>
    %c0_39 = arith.constant 0 : index
    %c0_40 = arith.constant 0 : index
    %c0_41 = arith.constant 0 : index
    %95 = vector.load %arg12[%c0_39, %c0_40, %c0_41] : memref<1x32x64xbf16, #tpu.memory_space<vmem>>, vector<1x32x64xbf16>
    %96 = vector.shape_cast %95 : vector<1x32x64xbf16> to vector<32x64xbf16>
    %cst_42 = arith.constant dense<0.000000e+00> : vector<8x64xf32>
    %97 = tpu.matmul %94, %96, %cst_42 {dimension_numbers = #tpu.dot_dimension_numbers<[1], [0], [0], [1], [0, 0, 1, 1], [], []>} : vector<8x32xbf16>, vector<32x64xbf16>, vector<8x64xf32> -> vector<8x64xf32>
    %c0_43 = arith.constant 0 : index
    %c0_44 = arith.constant 0 : index
    %c0_45 = arith.constant 0 : index
    %98 = vector.load %arg13[%c0_43, %c0_44, %c0_45] : memref<1x1x64xf32, #tpu.memory_space<vmem>>, vector<1x1x64xf32>
    %99 = vector.shape_cast %98 : vector<1x1x64xf32> to vector<1x64xf32>
    %100 = vector.broadcast %99 : vector<1x64xf32> to vector<8x64xf32>
    %101 = arith.addf %97, %100 : vector<8x64xf32>
    %cst_46 = arith.constant 5.000000e-01 : f32
    %102 = vector.broadcast %cst_46 : f32 to vector<8x64xf32>
    %103 = arith.mulf %102, %101 : vector<8x64xf32>
    %cst_47 = arith.constant 4.471500e-02 : f32
    %104 = vector.broadcast %cst_47 : f32 to vector<8x64xf32>
    %105 = arith.mulf %104, %101 : vector<8x64xf32>
    %106 = arith.mulf %105, %101 : vector<8x64xf32>
    %107 = arith.mulf %106, %101 : vector<8x64xf32>
    %108 = arith.addf %101, %107 : vector<8x64xf32>
    %cst_48 = arith.constant 0.797884583 : f32
    %109 = vector.broadcast %cst_48 : f32 to vector<8x64xf32>
    %110 = arith.mulf %109, %108 : vector<8x64xf32>
    %111 = math.tanh %110 : vector<8x64xf32>
    %cst_49 = arith.constant 1.000000e+00 : f32
    %112 = vector.broadcast %cst_49 : f32 to vector<8x64xf32>
    %113 = arith.addf %112, %111 : vector<8x64xf32>
    %114 = arith.mulf %103, %113 : vector<8x64xf32>
    %115 = arith.truncf %114 : vector<8x64xf32> to vector<8x64xbf16>
    %c0_50 = arith.constant 0 : index
    %c0_51 = arith.constant 0 : index
    %c0_52 = arith.constant 0 : index
    %116 = vector.load %arg14[%c0_50, %c0_51, %c0_52] : memref<1x64x32xbf16, #tpu.memory_space<vmem>>, vector<1x64x32xbf16>
    %117 = vector.shape_cast %116 : vector<1x64x32xbf16> to vector<64x32xbf16>
    %cst_53 = arith.constant dense<0.000000e+00> : vector<8x32xf32>
    %118 = tpu.matmul %115, %117, %cst_53 {dimension_numbers = #tpu.dot_dimension_numbers<[1], [0], [0], [1], [0, 0, 1, 1], [], []>} : vector<8x64xbf16>, vector<64x32xbf16>, vector<8x32xf32> -> vector<8x32xf32>
    %c0_54 = arith.constant 0 : index
    %c0_55 = arith.constant 0 : index
    %c0_56 = arith.constant 0 : index
    %119 = vector.load %arg15[%c0_54, %c0_55, %c0_56] : memref<1x1x32xf32, #tpu.memory_space<vmem>>, vector<1x1x32xf32>
    %120 = vector.shape_cast %119 : vector<1x1x32xf32> to vector<1x32xf32>
    %121 = vector.broadcast %120 : vector<1x32xf32> to vector<8x32xf32>
    %122 = arith.addf %118, %121 : vector<8x32xf32>
    %123 = arith.addf %122, %93 : vector<8x32xf32>
    %c0_57 = arith.constant 0 : index
    %c0_58 = arith.constant 0 : index
    %c0_59 = arith.constant 0 : index
    %124 = vector.load %arg16[%c0_57, %c0_58, %c0_59] : memref<1x1x32xf32, #tpu.memory_space<vmem>>, vector<1x1x32xf32>
    %125 = vector.shape_cast %124 : vector<1x1x32xf32> to vector<1x32xf32>
    %c0_60 = arith.constant 0 : index
    %c0_61 = arith.constant 0 : index
    %c0_62 = arith.constant 0 : index
    %126 = vector.load %arg17[%c0_60, %c0_61, %c0_62] : memref<1x1x32xf32, #tpu.memory_space<vmem>>, vector<1x1x32xf32>
    %127 = vector.shape_cast %126 : vector<1x1x32xf32> to vector<1x32xf32>
    %cst_63 = arith.constant dense<0.000000e+00> : vector<8xf32>
    %128 = vector.multi_reduction <add>, %123, %cst_63 [1] : vector<8x32xf32> to vector<8xf32>
    %129 = vector.shape_cast %128 : vector<8xf32> to vector<8x1xf32>
    %cst_64 = arith.constant 3.200000e+01 : f32
    %130 = vector.broadcast %cst_64 : f32 to vector<8x1xf32>
    %131 = arith.divf %129, %130 : vector<8x1xf32>
    %132 = vector.broadcast %131 : vector<8x1xf32> to vector<8x32xf32>
    %133 = arith.subf %123, %132 : vector<8x32xf32>
    %134 = arith.mulf %133, %133 : vector<8x32xf32>
    %cst_65 = arith.constant dense<0.000000e+00> : vector<8xf32>
    %135 = vector.multi_reduction <add>, %134, %cst_65 [1] : vector<8x32xf32> to vector<8xf32>
    %136 = vector.shape_cast %135 : vector<8xf32> to vector<8x1xf32>
    %cst_66 = arith.constant 3.200000e+01 : f32
    %137 = vector.broadcast %cst_66 : f32 to vector<8x1xf32>
    %138 = arith.divf %136, %137 : vector<8x1xf32>
    %cst_67 = arith.constant 9.99999996E-13 : f32
    %139 = vector.broadcast %cst_67 : f32 to vector<8x1xf32>
    %140 = arith.addf %138, %139 : vector<8x1xf32>
    %141 = math.rsqrt %140 : vector<8x1xf32>
    %142 = vector.broadcast %141 : vector<8x1xf32> to vector<8x32xf32>
    %143 = arith.mulf %133, %142 : vector<8x32xf32>
    %144 = vector.broadcast %125 : vector<1x32xf32> to vector<8x32xf32>
    %145 = arith.mulf %143, %144 : vector<8x32xf32>
    %146 = vector.broadcast %127 : vector<1x32xf32> to vector<8x32xf32>
    %147 = arith.addf %145, %146 : vector<8x32xf32>
    %c0_68 = arith.constant 0 : index
    %c0_69 = arith.constant 0 : index
    %148 = vector.load %arg23[%c0_68, %c0_69] : memref<8x32xf32, #tpu.memory_space<vmem>>, vector<8x32xf32>
    tpu.vector_store %arg23[%c0_68, %c0_69], %147 {strides = array<i32>} : memref<8x32xf32, #tpu.memory_space<vmem>>, vector<8x32xf32>,
    %c1_i32 = arith.constant 1 : i32
    %149 = arith.cmpi eq, %arg1, %c1_i32 : i32
    %150 = arith.extui %149 : i1 to i32
    %c0_i32_70 = arith.constant 0 : i32
    %151 = arith.cmpi ne, %150, %c0_i32_70 : i32
    scf.if %151 {
      %152 = vector.extract_strided_slice %147 {offsets = [0, 0], sizes = [1, 32], strides = [1, 1]} : vector<8x32xf32> to vector<1x32xf32>
      %153 = arith.truncf %152 : vector<1x32xf32> to vector<1x32xbf16>
      %c0_71 = arith.constant 0 : index
      %c0_72 = arith.constant 0 : index
      %154 = vector.load %arg18[%c0_71, %c0_72] : memref<32x32xbf16, #tpu.memory_space<vmem>>, vector<32x32xbf16>
      %cst_73 = arith.constant dense<0.000000e+00> : vector<1x32xf32>
      %155 = tpu.matmul %153, %154, %cst_73 {dimension_numbers = #tpu.dot_dimension_numbers<[1], [0], [0], [1], [0, 0, 1, 1], [], []>} : vector<1x32xbf16>, vector<32x32xbf16>, vector<1x32xf32> -> vector<1x32xf32>
      %c0_74 = arith.constant 0 : index
      %c0_75 = arith.constant 0 : index
      %156 = vector.load %arg19[%c0_74, %c0_75] : memref<1x32xf32, #tpu.memory_space<vmem>>, vector<1x32xf32>
      %157 = arith.addf %155, %156 : vector<1x32xf32>
      %158 = math.tanh %157 : vector<1x32xf32>
      %159 = arith.truncf %158 : vector<1x32xf32> to vector<1x32xbf16>
      %c0_76 = arith.constant 0 : index
      %c0_77 = arith.constant 0 : index
      %160 = vector.load %arg20[%c0_76, %c0_77] : memref<32x128xbf16, #tpu.memory_space<vmem>>, vector<32x128xbf16>
      %cst_78 = arith.constant dense<0.000000e+00> : vector<1x128xf32>
      %161 = tpu.matmul %159, %160, %cst_78 {dimension_numbers = #tpu.dot_dimension_numbers<[1], [0], [0], [1], [0, 0, 1, 1], [], []>} : vector<1x32xbf16>, vector<32x128xbf16>, vector<1x128xf32> -> vector<1x128xf32>
      %c0_79 = arith.constant 0 : index
      %c0_80 = arith.constant 0 : index
      %162 = vector.load %arg21[%c0_79, %c0_80] : memref<1x128xf32, #tpu.memory_space<vmem>>, vector<1x128xf32>
      %163 = arith.addf %161, %162 : vector<1x128xf32>
      %c0_81 = arith.constant 0 : index
      %c0_82 = arith.constant 0 : index
      %c0_83 = arith.constant 0 : index
      %164 = vector.load %arg22[%c0_81, %c0_82, %c0_83] : memref<1x1x128xf32, #tpu.memory_space<vmem>>, vector<1x1x128xf32>
      %165 = vector.shape_cast %164 : vector<1x1x128xf32> to vector<1x128xf32>
      %166 = vector.shape_cast %163 : vector<1x128xf32> to vector<1x1x128xf32>
      tpu.vector_store %arg22[%c0_81, %c0_82, %c0_83], %166 {strides = array<i32>} : memref<1x1x128xf32, #tpu.memory_space<vmem>>, vector<1x1x128xf32>,
    } else {
    }
    return
  }
  func.func @transform_0(%arg0: i32, %arg1: i32) -> (i32, i32, i32) {
    %c0_i32 = arith.constant 0 : i32
    %c0_i32_0 = arith.constant 0 : i32
    %c0_i32_1 = arith.constant 0 : i32
    return %arg0, %c0_i32, %c0_i32_0 : i32, i32, i32
  }
  func.func @transform_1(%arg0: i32, %arg1: i32) -> (i32, i32, i32) {
    %c0_i32 = arith.constant 0 : i32
    %c0_i32_0 = arith.constant 0 : i32
    %c0_i32_1 = arith.constant 0 : i32
    return %arg0, %c0_i32, %c0_i32_0 : i32, i32, i32
  }
  func.func @transform_2(%arg0: i32, %arg1: i32) -> (i32, i32) {
    %c0_i32 = arith.constant 0 : i32
    %c0_i32_0 = arith.constant 0 : i32
    %c0_i32_1 = arith.constant 0 : i32
    return %c0_i32, %c0_i32_0 : i32, i32
  }
  func.func @transform_3(%arg0: i32, %arg1: i32) -> (i32, i32) {
    %c0_i32 = arith.constant 0 : i32
    %c0_i32_0 = arith.constant 0 : i32
    %c0_i32_1 = arith.constant 0 : i32
    return %c0_i32, %c0_i32_0 : i32, i32
  }
  func.func @transform_4(%arg0: i32, %arg1: i32) -> (i32, i32, i32) {
    %c0_i32 = arith.constant 0 : i32
    %c0_i32_0 = arith.constant 0 : i32
    %c0_i32_1 = arith.constant 0 : i32
    return %arg1, %c0_i32, %c0_i32_0 : i32, i32, i32
  }
  func.func @transform_5(%arg0: i32, %arg1: i32) -> (i32, i32, i32) {
    %c0_i32 = arith.constant 0 : i32
    %c0_i32_0 = arith.constant 0 : i32
    %c0_i32_1 = arith.constant 0 : i32
    return %arg1, %c0_i32, %c0_i32_0 : i32, i32, i32
  }
  func.func @transform_6(%arg0: i32, %arg1: i32) -> (i32, i32, i32) {
    %c0_i32 = arith.constant 0 : i32
    %c0_i32_0 = arith.constant 0 : i32
    %c0_i32_1 = arith.constant 0 : i32
    return %arg1, %c0_i32, %c0_i32_0 : i32, i32, i32
  }
  func.func @transform_7(%arg0: i32, %arg1: i32) -> (i32, i32, i32) {
    %c0_i32 = arith.constant 0 : i32
    %c0_i32_0 = arith.constant 0 : i32
    %c0_i32_1 = arith.constant 0 : i32
    return %arg1, %c0_i32, %c0_i32_0 : i32, i32, i32
  }
  func.func @transform_8(%arg0: i32, %arg1: i32) -> (i32, i32, i32) {
    %c0_i32 = arith.constant 0 : i32
    %c0_i32_0 = arith.constant 0 : i32
    %c0_i32_1 = arith.constant 0 : i32
    return %arg1, %c0_i32, %c0_i32_0 : i32, i32, i32
  }
  func.func @transform_9(%arg0: i32, %arg1: i32) -> (i32, i32, i32) {
    %c0_i32 = arith.constant 0 : i32
    %c0_i32_0 = arith.constant 0 : i32
    %c0_i32_1 = arith.constant 0 : i32
    return %arg1, %c0_i32, %c0_i32_0 : i32, i32, i32
  }
  func.func @transform_10(%arg0: i32, %arg1: i32) -> (i32, i32, i32) {
    %c0_i32 = arith.constant 0 : i32
    %c0_i32_0 = arith.constant 0 : i32
    %c0_i32_1 = arith.constant 0 : i32
    return %arg1, %c0_i32, %c0_i32_0 : i32, i32, i32
  }
  func.func @transform_11(%arg0: i32, %arg1: i32) -> (i32, i32, i32) {
    %c0_i32 = arith.constant 0 : i32
    %c0_i32_0 = arith.constant 0 : i32
    %c0_i32_1 = arith.constant 0 : i32
    return %arg1, %c0_i32, %c0_i32_0 : i32, i32, i32
  }
  func.func @transform_12(%arg0: i32, %arg1: i32) -> (i32, i32, i32) {
    %c0_i32 = arith.constant 0 : i32
    %c0_i32_0 = arith.constant 0 : i32
    %c0_i32_1 = arith.constant 0 : i32
    return %arg1, %c0_i32, %c0_i32_0 : i32, i32, i32
  }
  func.func @transform_13(%arg0: i32, %arg1: i32) -> (i32, i32, i32) {
    %c0_i32 = arith.constant 0 : i32
    %c0_i32_0 = arith.constant 0 : i32
    %c0_i32_1 = arith.constant 0 : i32
    return %arg1, %c0_i32, %c0_i32_0 : i32, i32, i32
  }
  func.func @transform_14(%arg0: i32, %arg1: i32) -> (i32, i32, i32) {
    %c0_i32 = arith.constant 0 : i32
    %c0_i32_0 = arith.constant 0 : i32
    %c0_i32_1 = arith.constant 0 : i32
    return %arg1, %c0_i32, %c0_i32_0 : i32, i32, i32
  }
  func.func @transform_15(%arg0: i32, %arg1: i32) -> (i32, i32, i32) {
    %c0_i32 = arith.constant 0 : i32
    %c0_i32_0 = arith.constant 0 : i32
    %c0_i32_1 = arith.constant 0 : i32
    return %arg1, %c0_i32, %c0_i32_0 : i32, i32, i32
  }
  func.func @transform_16(%arg0: i32, %arg1: i32) -> (i32, i32) {
    %c0_i32 = arith.constant 0 : i32
    %c0_i32_0 = arith.constant 0 : i32
    %c0_i32_1 = arith.constant 0 : i32
    return %c0_i32, %c0_i32_0 : i32, i32
  }
  func.func @transform_17(%arg0: i32, %arg1: i32) -> (i32, i32) {
    %c0_i32 = arith.constant 0 : i32
    %c0_i32_0 = arith.constant 0 : i32
    %c0_i32_1 = arith.constant 0 : i32
    return %c0_i32, %c0_i32_0 : i32, i32
  }
  func.func @transform_18(%arg0: i32, %arg1: i32) -> (i32, i32) {
    %c0_i32 = arith.constant 0 : i32
    %c0_i32_0 = arith.constant 0 : i32
    %c0_i32_1 = arith.constant 0 : i32
    return %c0_i32, %c0_i32_0 : i32, i32
  }
  func.func @transform_19(%arg0: i32, %arg1: i32) -> (i32, i32) {
    %c0_i32 = arith.constant 0 : i32
    %c0_i32_0 = arith.constant 0 : i32
    %c0_i32_1 = arith.constant 0 : i32
    return %c0_i32, %c0_i32_0 : i32, i32
  }
  func.func @transform_20(%arg0: i32, %arg1: i32) -> (i32, i32, i32) {
    %c0_i32 = arith.constant 0 : i32
    %c0_i32_0 = arith.constant 0 : i32
    %c0_i32_1 = arith.constant 0 : i32
    return %arg0, %c0_i32, %c0_i32_0 : i32, i32, i32
  }
}

</mosaic_0001>

<bundles_post_ra>
// kernel: category_classifier_forward.1
= control target key start
LH: loop header
LB: loop body
LE: loop exit
PB: predicated region body
PF: predicated region fallthrough
CT: control target
= control target key end

     0   :  { %s2630_s0 = inlined_call_operand.vmem [shape: f32[2,8,32], index: 0, kind: input, shape index: {}]   ;;  %s2631_s1 = inlined_call_operand.vmem [shape: f32[2,1,8], index: 1, kind: input, shape index: {}]   ;;  %s2632_s2 = inlined_call_operand.vmem [shape: f32[1,32], index: 2, kind: input, shape index: {}]   ;;  %s2633_s3 = inlined_call_operand.vmem [shape: f32[1,32], index: 3, kind: input, shape index: {}]   ;;  %s2634_s4 = inlined_call_operand.vmem [shape: bf16[2,32,96], index: 4, kind: input, shape index: {}]   ;;  %s2635_s5 = inlined_call_operand.vmem [shape: f32[2,1,96], index: 5, kind: input, shape index: {}]   ;;  %s2636_s6 = inlined_call_operand.vmem [shape: bf16[2,32,32], index: 6, kind: input, shape index: {}]   ;;  %s2637_s7 = inlined_call_operand.vmem [shape: f32[2,1,32], index: 7, kind: input, shape index: {}]   ;;  %s2638_s8 = inlined_call_operand.vmem [shape: f32[2,1,32], index: 8, kind: input, shape index: {}]   ;;  %s2639_s9 = inlined_call_operand.vmem [shape: f32[2,1,32], index: 9, kind: input, shape index: {}]   ;;  %s2640_s10 = inlined_call_operand.vmem [shape: bf16[2,32,64], index: 10, kind: input, shape index: {}]   ;;  %s2641_s11 = inlined_call_operand.vmem [shape: f32[2,1,64], index: 11, kind: input, shape index: {}]   ;;  %s2642_s12 = inlined_call_operand.vmem [shape: bf16[2,64,32], index: 12, kind: input, shape index: {}]   ;;  %s2643_s13 = inlined_call_operand.vmem [shape: f32[2,1,32], index: 13, kind: input, shape index: {}]   ;;  %s2644_s14 = inlined_call_operand.vmem [shape: f32[2,1,32], index: 14, kind: input, shape index: {}]   ;;  %s2645_s15 = inlined_call_operand.vmem [shape: f32[2,1,32], index: 15, kind: input, shape index: {}]   ;;  %s2646_s16 = inlined_call_operand.vmem [shape: bf16[32,32], index: 16, kind: input, shape index: {}]   ;;  %s2647_s17 = inlined_call_operand.vmem [shape: f32[1,32], index: 17, kind: input, shape index: {}]   ;;  %s2648_s18 = inlined_call_operand.vmem [shape: bf16[32,128], index: 18, kind: input, shape index: {}]   ;;  %s2649_s19 = inlined_call_operand.vmem [shape: f32[1,128], index: 19, kind: input, shape index: {}]   ;;  %s2650_s20 = inlined_call_operand.hbm [shape: f32[2,1,128], index: 20, kind: output, shape index: {}]  }
   0x1   :  { %2666 = sst [smem:[#allocation18_spill]] %s2630_s0 }
   0x2   :  { %2667 = sst [smem:[#allocation19_spill]] %s2631_s1 }
   0x3   :  { %2668 = sst [smem:[#allocation20_spill]] %s2632_s2 }
   0x4   :  { %2669 = sst [smem:[#allocation21_spill]] %s2633_s3 }
   0x5   :  { %2670 = sst [smem:[#allocation22_spill]] %s2634_s4 }
   0x6   :  { %2671 = sst [smem:[#allocation23_spill]] %s2636_s6 }
   0x7   :  { %2672 = sst [smem:[#allocation24_spill]] %s2639_s9 }
   0x8   :  { %2673 = sst [smem:[#allocation25_spill]] %s2640_s10 }
   0x9   :  { %2674 = sst [smem:[#allocation26_spill]] %s2644_s14 }
   0xa   :  { %2675 = sst [smem:[#allocation27_spill]] %s2645_s15 }
   0xb   :  { %2676 = sst [smem:[#allocation28_spill]] %s2646_s16 }
   0xc   :  { %2677 = sst [smem:[#allocation29_spill]] %s2647_s17 }
   0xd   :  { %2678 = sst [smem:[#allocation30_spill]] %s2648_s18 }
   0xe   :  { %2679 = sst [smem:[#allocation31_spill]] %s2649_s19 }
   0xf   :  { %2680 = sst [smem:[#allocation32_spill]] %s2650_s20 }
  0x10   :  { %25 = vsyncpa [#allocation4], 0 }
  0x11   :  { %27 = vsyncpa [#allocation4 + $0x1], 0  ;;  %s2298_s1 = smov 0   ;;  %s2300_s22 = smov 0  }
  0x12   :  { %s2302_s23 = smov 0   ;;  %s2304_s24 = smov 0  }
  0x13   :  { %s2306_s2 = smov 0   ;;  %s2308_s25 = smov 0  }
  0x14   :  { %s2310_s3 = smov 0   ;;  %s2312_s26 = smov 0  }
  0x15 LB: > { %2681 = sst [smem:[#allocation6_spill]] %s2152_s1  ;;  %s1813_s27 = sadd.s32 4294967295, %s2180_s26   ;;  %s2180_s26 = sphi %s2312_s26, %s33_s26   ;;  %s2176_s3 = sphi %s2310_s3, %s2736_s3   ;;  %s2172_s25 = sphi %s2308_s25, %s2735_s25   ;;  %s2168_s2 = sphi %s2306_s2, %s2734_s2   ;;  %s2164_s24 = sphi %s2304_s24, %s2733_s24   ;;  %s2160_s23 = sphi %s2302_s23, %s2732_s23   ;;  %s2156_s22 = sphi %s2300_s22, %s2738_s22   ;;  %s2152_s1 = sphi %s2298_s1, %s2737_s1  }
  0x16   : > { %2682 = sst [smem:[#allocation7_spill]] %s2160_s23  ;;  %s1814_s28 = sadd.s32 4294967294, %s2180_s26  }
  0x17   : > { %2683 = sst [smem:[#allocation8_spill]] %s2164_s24  ;;  %s42_s4 = sadd.s32 1, %s2172_s25 }
  0x18   : > { %2684 = sst [smem:[#allocation9_spill]] %s2168_s2  ;;  %p43_p0 = scmp.ge.s32.totalorder %s42_s4, 2 }
  0x19   : > { %2685 = sst [smem:[#allocation10_spill]] %s2172_s25  ;;  %s45_s29 = sadd.s32 1, %s2176_s3 }
  0x1a   : > { %2686 = sst [smem:[#allocation11_spill]] %s2176_s3  ;;  %p552_p1 = scmp.ne.s32.totalorder %s2160_s23, %s2156_s22 }
  0x1b   : > { %2687 = sst [smem:[#allocation12_spill]] %s2180_s26  ;;  %p553_p2 = scmp.eq.s32.totalorder %s1813_s27, 3 }
  0x1c   : > { %s2740_s4 = smov (%p43_p0, %s42_s4), 0  ;;  %s2742_s29 = smov (!%p43_p0, %s45_s29), %s2176_s3 }
  0x1d   : > { %2688 = sst [smem:[#allocation13_spill]] %s2740_s4  ;;  %p2347_p3 = por %p553_p2, %p552_p1 }
  0x1e   : > { %p558_p4 = scmp.ne.s32.totalorder %s2156_s22, %s2152_s1  ;;  %p47_p5 = scmp.ge.s32.totalorder %s2742_s29, 2 }
  0x1f   : > { %s2689_s30 = scalar_select %p2347_p3, 1, 0 }
  0x20   : > { %p559_p6 = scmp.eq.s32.totalorder %s1814_s28, 3  ;;  %p1817_p7 = scmp.ge.s32.totalorder %s2180_s26, 1 }
  0x21   : > { %2690 = sst [smem:[#allocation14_spill]] %s2689_s30  ;;  %p688_p8 = scmp.lt.s32.totalorder %s2180_s26, 5 }
  0x22   : > { %s2744_s29 = smov (%p47_p5, %s2742_s29), 0  ;;  %p2357_p9 = por %p559_p6, %p558_p4 }
  0x23   : > { %2691 = sst [smem:[#allocation15_spill]] %s2744_s29  ;;  %p689_p10 = pnand %p1817_p7, %p688_p8 }
  0x24   : > { %s2692_s0 = scalar_select %p2357_p9, 1, 0 }
  0x25   : > { %s539_s21 = ssub.s32 %s2176_s3, %s2744_s29  ;;  %s542_s27 = sadd.s32 1, %s2160_s23 }
  0x26   : > { %2693 = sst [smem:[#allocation16_spill]] %s2692_s0  ;;  %p540_p11 = scmp.eq.s32.totalorder %s539_s21, 0 }
  0x27   : > { %692 = sbr.rel (%p689_p10) target bundleno = 3215 (0xc8f), region = 100  ;;  %p791_p12 = scmp.lt.s32.totalorder (!%p689_p10), %s2168_s2, 1 }
  0x28   : > { %s2365_s4 = scalar_select %p540_p11, %s2160_s23, %s542_s27  }
  0x29   : > { %p798_p13 = scmp.lt.s32.totalorder (!%p689_p10), %s2164_s24, 1  ;;  %s2696_s1 = sld [smem:[#allocation18_spill]] (!%p689_p10) }
  0x2a   : > { %2694 = sst [smem:[#allocation17_spill]] %s2365_s4  ;;  %s2703_s14 = sand.u32 (!%p689_p10), 1, %s2156_s22  }
  0x2b   : > { %s2697_s19 = sld [smem:[#allocation22_spill]] (!%p689_p10)  ;;  %s2440_s15 = scalar_lea.vmem (!%p689_p10), [#allocation3], %s2703_s14 }
  0x2c   : > { %s2371_s25 = scalar_select %p791_p12, %s2168_s2, 1 }
  0x2d   : > { %s2374_s0 = scalar_select %p798_p13, %s2164_s24, 1 }
  0x2e   : > { %s1818_s21 = sshll.u32 %s2371_s25, 3  ;;  %s2698_s6 = sld [smem:[#allocation23_spill]] }
  0x2f   : > { %s794_s26 = scalar_lea.vmem %s2696_s1, %s1818_s21  ;;  %s1867_s20 = sshll.u32 %s2374_s0, 4 }
  0x30   : > { %s2700_s10 = sld [smem:[#allocation25_spill]]  ;;  %s835_s23 = scalar_lea.vmem %s2643_s13, %s2374_s0 }
  0x31   : > { %s2388_s17 = scalar_lea.vmem %s2697_s19, %s1867_s20  ;;  %s2701_s30 = sld [smem:[#allocation26_spill]] }
  0x32   : > { %s2704_s24 = sld [smem:[#allocation8_spill]] }
  0x34   : > { %s2397_s28 = scalar_lea.vmem %s2698_s6, %s1867_s20  ;;  %s1870_s6 = sshll.u32 %s2374_s0, 5 }
  0x35   : > { %s2428_s21 = scalar_lea.vmem %s2642_s12, %s1870_s6 }
  0x36   : > { %s2414_s18 = scalar_lea.vmem %s2700_s10, %s1867_s20  ;;  %s2702_s10 = sld [smem:[#allocation27_spill]] }
  0x37   : > { %s838_s3 = scalar_lea.vmem %s2701_s30, %s2374_s0 }
  0x38   : > { %p1827_p0 = scmp.ne.s32.totalorder %s2704_s24, 0 }
  0x39   : > { %s2705_s24 = sld [smem:[#allocation20_spill]] (!%p1827_p0) }
  0x3a   : > { %846 = sbr.rel (%p1827_p0) target bundleno = 373 (0x175), region = 104  ;;  %s2706_s29 = sld [smem:[#allocation21_spill]] (!%p1827_p0) }
  0x3c   : > { %s841_s9 = scalar_lea.vmem %s2702_s10, %s2374_s0 }
  0x3f   : > { %v847_v0 = vld [vmem:[%s794_s26] sm:$0xff]  ;;  %vm850_vm0 = vcmask 261120  }
  0x40   : > { %v851_v1 = vsel %vm850_vm0, %v847_v0, 0.0  ;;  %v1828_v11 = vld [vmem:[%s2705_s24] ss:$0 sm:$0xff] }
  0x41   : > { %852 = vadd.xlane.f32.xlu0 %v851_v1  ;;  %v1829_v13 = vld [vmem:[%s2706_s29] ss:$0 sm:$0xff] }
  0xca   : > { %v853_v2 = vpop.xlane.xlu0 %852 }
  0xcb   : > { %v855_v3 = vmul.f32 0.03125, %v853_v2 }
  0xcd   : > { %v856_v4 = vsub.f32 %v847_v0, %v855_v3 }
  0xcf   : > { %v857_v5 = vmul.f32 %v856_v4, %v856_v4 }
  0xd1   : > { %v858_v6 = vsel %vm850_vm0, %v857_v5, 0.0 }
  0xd2   : > { %859 = vadd.xlane.f32.xlu0 %v858_v6 }
 0x15b   : > { %v860_v7 = vpop.xlane.xlu0 %859 }
 0x15c   : > { %v861_v8 = vmul.f32 0.03125, %v860_v7 }
 0x15e   : > { %v862_v9 = vadd.f32 1e-12, %v861_v8 }
 0x160   : > { %2056 = vrsqrt.f32 %v862_v9 }
 0x16d   : > { %v2057_v10 = vpop.eup %2056 }
 0x16e   : > { %v864_v12 = vmul.f32 %v2057_v10, %v856_v4 }
 0x170   : > { %v871_v14 = vmul.f32 %v1828_v11, %v864_v12 }
 0x172   : > { %v878_v15 = vadd.f32 %v1829_v13, %v871_v14 }
 0x174   : > { %879 = vst.msk [vmem:[#allocation2] sm:$0xff] %vm850_vm0, %v878_v15 }
 0x175 PF: > { %v2058_v16 = vld [vmem:[%s2388_s17 + $0x8] sm:$0xff]   ;;  %v2182_v17 = vmov 0.0   ;;  %v2059_v18 = vld [vmem:[%s2388_s17] sm:$0xff]   ;;  %vm2183_vm1 = vmmov 0   ;;  %vm906_vm2 = vcmask 261120   ;;  %s2707_s1 = scalar_lea.vmem %s2635_s5, %s2374_s0  ;;  %s2184_s4 = smov 112  }
 0x176   : > { %1899 = vmatprep.subr.bf16.mxu0 %v2182_v17  ;;  %1907 = vmatprep.subr.bf16.mxu1 %v2182_v17  ;;  %v1830_v21 = vld [vmem:[%s2707_s1] ss:$0 sm:$0xff]  ;;  %s2185_s2 = smov 96   ;;  %s2186_s19 = smov 80   ;;  %vm954_vm3 = vcmask 130048   ;;  %vm1009_vm4 = vcmask 64512  }
 0x177   : > { %1900 = vmatpush3.bf16.msra.mxu0 %v2058_v16  ;;  %1903 = vmatprep.mubr.msk.bf16.mxu0 %vm2183_vm1, %v2182_v17  ;;  %s2708_s14 = sld [smem:[#allocation19_spill]]  ;;  %s2188_s10 = smov 48   ;;  %vm1027_vm5 = vcmask 1043456   ;;  %v2060_v6 = vld [vmem:[%s2397_s28 + $0x8] sm:$0xff]   ;;  %v2061_v7 = vld [vmem:[%s2397_s28] sm:$0xff]   ;;  %vm1402_vm6 = vcmask 523264  }
 0x178   : > { %1901 = vmatprep.subr.bf16.mxu0 %v2182_v17  ;;  %1909 = vmatprep.mubr.msk.bf16.mxu1 %vm2183_vm1, %v2182_v17  ;;  %s2189_s24 = smov 16   ;;  %s2710_s30 = scalar_lea.vmem %s2637_s7, %s2374_s0 }
 0x179   : > { %s2711_s27 = scalar_lea.vmem %s2638_s8, %s2374_s0  ;;  %s2714_s16 = scalar_lea.vmem %s2641_s11, %s2374_s0 }
 0x17a   : > { %s2717_s26 = sld [smem:[#allocation8_spill]] }
 0x17b   : > { %v2458_v19 = vld [vmem:[#allocation2] sm:$0xff]  ;;  %1902 = vmatpush3.bf16.msra.mxu0 %v2059_v18 }
 0x17c   : > { %v882_v20 = vpack.c.bf16 %v2458_v19, %v2458_v19  ;;  %1913 = vmatprep.subr.bf16.mxu0 %v2182_v17 }
 0x17d   : > { %s2709_s6 = scalar_lea.vmem %s2708_s14, %s2371_s25  ;;  %s2187_s25 = smov 64  }
 0x17e   : > { %1904 = vmatmul.mubr.msk.bf16.vlgmr.msra.gmra.mxu0 %vm906_vm2, %v882_v20  ;;  %v1835_v34 = vld [vmem:[%s2709_s6] ss:$0 sm:$0xff] }
 0x17f   : > { %1915 = vmatprep.mubr.msk.bf16.mxu0 %vm2183_vm1, %v2182_v17 }
 0x180   : > { %p1857_p1 = scmp.ne.s32.totalorder %s2717_s26, 1 }
 0x181   : > { %s2718_s17 = sld [smem:[#allocation28_spill]] (!%p1857_p1) }
 0x182   : > { %s2719_s1 = sld [smem:[#allocation30_spill]] (!%p1857_p1) }
 0x23e   : > { %v944_v22 = vpop.f32.mrf.mxu0 }
 0x23f   : > { %v945_v23 = vadd.f32 %v1830_v21, %v944_v22  ;;  %v1839_v21 = vld [vmem:[%s2710_s30] ss:$0 sm:$0xff] }
 0x240   : > { %v1905_v24 = vpop.f32.mrf.mxu0 }
 0x241   : > { %v950_v25 = vpack.c.bf16 %v945_v23, %v945_v23 }
 0x242   : > { %v947_v26 = vpop.f32.mrf.mxu0 }
 0x243   : > { %1071 = vrot.lane.b32.xlu1 %v950_v25, %s2184_s4  ;;  %952 = vrot.lane.b32.xlu0 %v950_v25, %s2185_s2  ;;  %s2720_s4 = smov (!%p1857_p1), %s2719_s1 }
 0x244   : > { %v1906_v27 = vpop.f32.mrf.mxu0 }
 0x247   : > { %1073 = vrot.lane.b32.xlu0 %v950_v25, %s2186_s19 }
 0x2b5   : > { %v953_v28 = vpop.permute.xlu0 %952  ;;  %v1072_v32 = vpop.permute.xlu1 %1071 }
 0x2b6   : > { %v959_v29 = vsel %vm954_vm3, %v953_v28, 0 }
 0x2b7   : > { %1908 = vmatpush3.bf16.xpose.msra.mxu1 %v959_v29 }
 0x2b8   : > { %1919 = vmatprep.subr.bf16.mxu1 %v2182_v17 }
 0x2b9   : > { %v1074_v30 = vpop.permute.xlu0 %1073 }
 0x2ba   : > { %v1079_v31 = vsel %vm954_vm3, %v1074_v30, 0 }
 0x2be   : > { %1910 = vmatmul.mubr.msk.bf16.vlgmr.msra.gmra.mxu1 %vm954_vm3, %v950_v25 }
 0x2bf   : > { %1920 = vmatpush3.bf16.xpose.msra.mxu1 %v1079_v31  ;;  %1921 = vmatprep.mubr.msk.bf16.mxu1 %vm2183_vm1, %v2182_v17 }
 0x2c0   : > { %1931 = vmatprep.subr.bf16.mxu1 %v2182_v17 }
 0x2c6   : > { %1922 = vmatmul.mubr.msk.bf16.vlgmr.msra.gmra.mxu1 %vm954_vm3, %v1072_v32 }
 0x2c7   : > { %1935 = vmatprep.mubr.msk.bf16.mxu1 %vm2183_vm1, %v2182_v17  ;;  %1932 = vmatpush3.bf16.msra.mxu1 %v2060_v6 }
 0x2c8   : > { %1933 = vmatprep.subr.bf16.mxu1 %v2182_v17 }
 0x2cb   : > { %1934 = vmatpush3.bf16.msra.mxu1 %v2061_v7 }
 0x2cc   : > { %1947 = vmatprep.subr.bf16.mxu1 %v2182_v17 }
 0x37e   : > { %v995_v33 = vpop.f32.mrf.mxu1 }
 0x37f   : > { %v1001_v35 = vmul.f32 0.25, %v995_v33 }
 0x380   : > { %v1911_v36 = vpop.f32.mrf.mxu1 }
 0x381   : > { %v1008_v37 = vadd.f32 %v1835_v34, %v1001_v35  ;;  %v2063_v35 = vld [vmem:[%s2414_s18] sm:$0xff]  }
 0x382   : > { %v998_v38 = vpop.f32.mrf.mxu1 }
 0x383   : > { %v1010_v39 = vsel %vm1009_vm4, %v1008_v37, -inf }
 0x384   : > { %1011 = vmax.xlane.f32.xlu1 %v1010_v39  ;;  %v1912_v40 = vpop.f32.mrf.mxu1  ;;  %v1843_v39 = vld [vmem:[%s2711_s27] ss:$0 sm:$0xff] }
 0x386   : > { %v1115_v41 = vpop.f32.mrf.mxu1 }
 0x387   : > { %v1121_v42 = vmul.f32 0.25, %v1115_v41 }
 0x388   : > { %v1923_v43 = vpop.f32.mrf.mxu1 }
 0x389   : > { %v1122_v44 = vadd.f32 %v1835_v34, %v1121_v42  ;;  %v2062_v34 = vld [vmem:[%s2414_s18 + $0x8] sm:$0xff]   ;;  %s2712_s18 = sld [smem:[#allocation24_spill]] }
 0x38a   : > { %v1118_v45 = vpop.f32.mrf.mxu1 }
 0x38b   : > { %v1123_v46 = vsel %vm1009_vm4, %v1122_v44, -inf  ;;  %v2064_v45 = vld [vmem:[%s2428_s21 + $0x18] sm:$0xff]  }
 0x38c   : > { %1124 = vmax.xlane.f32.xlu0 %v1123_v46  ;;  %v1924_v47 = vpop.f32.mrf.mxu1  ;;  %v2065_v46 = vld [vmem:[%s2428_s21 + $0x10] sm:$0xff]  }
 0x38d   : > { %v2066_v47 = vld [vmem:[%s2428_s21 + $0x8] sm:$0xff]  }
 0x38f   : > { %s2713_s2 = scalar_lea.vmem %s2712_s18, %s2374_s0 }
 0x390   : > { %v1844_v41 = vld [vmem:[%s2713_s2] ss:$0 sm:$0xff] }
 0x40d   : > { %v1012_v48 = vpop.xlane.xlu1 %1011 }
 0x40e   : > { %v1013_v49 = vsub.f32 %v1008_v37, %v1012_v48  ;;  %v2067_v48 = vld [vmem:[%s2428_s21] sm:$0xff]  }
 0x410   : > { %v1014_v50 = vmul.f32 1.442695, %v1013_v49  ;;  %v1845_v49 = vld [vmem:[%s2714_s16] ss:$0 sm:$0xff]  ;;  %s2721_s16 = sld [smem:[#allocation29_spill]] (!%p1857_p1) }
 0x412   : > { %2068 = vpow2.f32 %v1014_v50 }
 0x415   : > { %v1125_v51 = vpop.xlane.xlu0 %1124 }
 0x416   : > { %v1126_v52 = vsub.f32 %v1122_v44, %v1125_v51 }
 0x418   : > { %v1127_v53 = vmul.f32 1.442695, %v1126_v52 }
 0x41a   : > { %2070 = vpow2.f32 %v1127_v53 }
 0x41f   : > { %v2069_v54 = vpop.eup %2068 }
 0x420   : > { %v1016_v55 = vsel %vm1009_vm4, %v2069_v54, 0.0 }
 0x421   : > { %1017 = vadd.xlane.f32.xlu0 %v1016_v55 }
 0x427   : > { %v2071_v56 = vpop.eup %2070 }
 0x428   : > { %v1129_v57 = vsel %vm1009_vm4, %v2071_v56, 0.0 }
 0x429   : > { %1130 = vadd.xlane.f32.xlu1 %v1129_v57 }
 0x437   : > { %1022 = vrot.lane.b32.xlu0 %v950_v25, %s2187_s25 }
 0x43a   : > { %1135 = vrot.lane.b32.xlu1 %v950_v25, %s2188_s10 }
 0x4aa   : > { %v1018_v58 = vpop.xlane.xlu0 %1017 }
 0x4ab   : > { %2072 = vrcp.f32 %v1018_v58 }
 0x4ae   : > { %v1023_v59 = vpop.permute.xlu0 %1022 }
 0x4af   : > { %v1029_v60 = vsel %vm1027_vm5, %v1023_v59, 0 }
 0x4b0   : > { %1914 = vmatpush3.bf16.msra.mxu0 %v1029_v60 }
 0x4b1   : > { %1925 = vmatprep.subr.bf16.mxu0 %v2182_v17 }
 0x4b2   : > { %v1131_v61 = vpop.xlane.xlu1 %1130 }
 0x4b3   : > { %2074 = vrcp.f32 %v1131_v61 }
 0x4b6   : > { %v1136_v0 = vpop.permute.xlu1 %1135 }
 0x4b7   : > { %v1141_v2 = vsel %vm1027_vm5, %v1136_v0, 0  ;;  %v1849_v0 = vld [vmem:[%s835_s23] ss:$0 sm:$0xff]  ;;  %s2722_s23 = sld [smem:[#allocation31_spill]] (!%p1857_p1) }
 0x4b8   : > { %v2073_v62 = vpop.eup %2072 }
 0x4b9   : > { %v1020_v63 = vmul.f32 %v2073_v62, %v2069_v54 }
 0x4bb   : > { %v1021_v1 = vpack.c.bf16 %v1020_v63, %v1020_v63 }
 0x4bd   : > { %1916 = vmatmul.mubr.msk.bf16.vlgmr.msra.gmra.mxu0 %vm1009_vm4, %v1021_v1 }
 0x4be   : > { %1926 = vmatpush3.bf16.msra.mxu0 %v1141_v2  ;;  %1927 = vmatprep.mubr.msk.bf16.mxu0 %vm2183_vm1, %v2182_v17 }
 0x4bf   : > { %1939 = vmatprep.subr.bf16.mxu0 %v2182_v17 }
 0x4c0   : > { %v2075_v3 = vpop.eup %2074 }
 0x4c1   : > { %v1133_v4 = vmul.f32 %v2075_v3, %v2071_v56 }
 0x4c3   : > { %v1134_v5 = vpack.c.bf16 %v1133_v4, %v1133_v4 }
 0x4c5   : > { %1928 = vmatmul.mubr.msk.bf16.vlgmr.msra.gmra.mxu0 %vm1009_vm4, %v1134_v5 }
 0x4c6   : > { %1943 = vmatprep.mubr.msk.bf16.mxu0 %vm2183_vm1, %v2182_v17  ;;  %1940 = vmatpush3.bf16.msra.mxu0 %v2062_v34 }
 0x4c7   : > { %1941 = vmatprep.subr.bf16.mxu0 %v2182_v17 }
 0x4ca   : > { %1942 = vmatpush3.bf16.msra.mxu0 %v2063_v35 }
 0x57d   : > { %v1065_v8 = vpop.f32.mrf.mxu0 }
 0x57f   : > { %v1917_v9 = vpop.f32.mrf.mxu0 }
 0x581   : > { %v1068_v10 = vpop.f32.mrf.mxu0 }
 0x583   : > { %v1918_v11 = vpop.f32.mrf.mxu0 }
 0x585   : > { %v1177_v12 = vpop.f32.mrf.mxu0 }
 0x586   : > { %1184 = vrot.lane.b32.xlu1 %v1177_v12, %s2189_s24 }
 0x587   : > { %v1929_v13 = vpop.f32.mrf.mxu0 }
 0x589   : > { %v1180_v14 = vpop.f32.mrf.mxu0 }
 0x58b   : > { %v1930_v15 = vpop.f32.mrf.mxu0 }
 0x5f8   : > { %v1185_v16 = vpop.permute.xlu1 %1184 }
 0x5f9   : > { %v1187_v18 = vsel %vm954_vm3, %v1065_v8, %v1185_v16 }
 0x5fa   : > { %v1188_v20 = vpack.c.bf16 %v1187_v18, %v1187_v18  ;;  %v1855_v18 = vld [vmem:[%s838_s3] ss:$0 sm:$0xff] }
 0x5fc   : > { %1936 = vmatmul.mubr.msk.bf16.vlgmr.msra.gmra.mxu1 %vm906_vm2, %v1188_v20 }
 0x5fd   : > { %1955 = vmatprep.mubr.msk.bf16.mxu1 %vm2183_vm1, %v2182_v17  ;;  %1948 = vmatpush3.bf16.msra.mxu1 %v2064_v45 }
 0x5fe   : > { %1949 = vmatprep.subr.bf16.mxu1 %v2182_v17 }
 0x601   : > { %1950 = vmatpush3.bf16.msra.mxu1 %v2065_v46 }
 0x602   : > { %1951 = vmatprep.subr.bf16.mxu1 %v2182_v17 }
 0x605   : > { %1952 = vmatpush3.bf16.msra.mxu1 %v2066_v47 }
 0x606   : > { %1953 = vmatprep.subr.bf16.mxu1 %v2182_v17 }
 0x609   : > { %1954 = vmatpush3.bf16.msra.mxu1 %v2067_v48 }
 0x6bc   : > { %v1249_v22 = vpop.f32.mrf.mxu1 }
 0x6bd   : > { %v1250_v23 = vadd.f32 %v1839_v21, %v1249_v22  ;;  %v1856_v21 = vld [vmem:[%s841_s9] ss:$0 sm:$0xff] }
 0x6be   : > { %v1937_v24 = vpop.f32.mrf.mxu1 }
 0x6bf   : > { %v1255_v25 = vadd.f32 %v1250_v23, %v2458_v19 }
 0x6c0   : > { %v1252_v26 = vpop.f32.mrf.mxu1 }
 0x6c1   : > { %v1258_v27 = vsel %vm906_vm2, %v1255_v25, 0.0 }
 0x6c2   : > { %1259 = vadd.xlane.f32.xlu0 %v1258_v27  ;;  %v1938_v28 = vpop.f32.mrf.mxu1 }
 0x74b   : > { %v1260_v29 = vpop.xlane.xlu0 %1259 }
 0x74c   : > { %v1262_v30 = vmul.f32 0.03125, %v1260_v29 }
 0x74e   : > { %v1263_v31 = vsub.f32 %v1255_v25, %v1262_v30 }
 0x750   : > { %v1264_v32 = vmul.f32 %v1263_v31, %v1263_v31 }
 0x752   : > { %v1265_v33 = vsel %vm906_vm2, %v1264_v32, 0.0 }
 0x753   : > { %1266 = vadd.xlane.f32.xlu1 %v1265_v33 }
 0x7dc   : > { %v1267_v19 = vpop.xlane.xlu1 %1266 }
 0x7dd   : > { %v1268_v36 = vmul.f32 0.03125, %v1267_v19 }
 0x7df   : > { %v1269_v37 = vadd.f32 1e-12, %v1268_v36 }
 0x7e1   : > { %2076 = vrsqrt.f32 %v1269_v37 }
 0x7ee   : > { %v2077_v38 = vpop.eup %2076 }
 0x7ef   : > { %v1271_v40 = vmul.f32 %v2077_v38, %v1263_v31 }
 0x7f1   : > { %v1278_v42 = vmul.f32 %v1843_v39, %v1271_v40 }
 0x7f3   : > { %v1285_v43 = vadd.f32 %v1844_v41, %v1278_v42 }
 0x7f5   : > { %v1286_v44 = vpack.c.bf16 %v1285_v43, %v1285_v43 }
 0x7f7   : > { %1944 = vmatmul.mubr.msk.bf16.vlgmr.msra.gmra.mxu0 %vm906_vm2, %v1286_v44 }
 0x8b7   : > { %v1347_v50 = vpop.f32.mrf.mxu0 }
 0x8b8   : > { %v1348_v51 = vadd.f32 %v1845_v49, %v1347_v50 }
 0x8b9   : > { %v1945_v52 = vpop.f32.mrf.mxu0 }
 0x8ba   : > { %v1354_v53 = vmul.f32 0.044715, %v1348_v51  ;;  %v1353_v17 = vmul.f32 0.5, %v1348_v51 }
 0x8bb   : > { %v1350_v54 = vpop.f32.mrf.mxu0 }
 0x8bc   : > { %v1355_v55 = vmul.f32 %v1354_v53, %v1348_v51 }
 0x8bd   : > { %v1946_v56 = vpop.f32.mrf.mxu0 }
 0x8be   : > { %v1356_v57 = vmul.f32 %v1355_v55, %v1348_v51 }
 0x8c0   : > { %v1357_v58 = vadd.f32 %v1356_v57, %v1348_v51 }
 0x8c2   : > { %v1358_v59 = vmul.f32 0.7978846, %v1357_v58 }
 0x8c4   : > { %2078 = vtanh.f32 %v1358_v59 }
 0x8d1   : > { %v2079_v60 = vpop.eup %2078 }
 0x8d2   : > { %v1360_v61 = vadd.f32 1.0, %v2079_v60 }
 0x8d4   : > { %v1361_v62 = vmul.f32 %v1360_v61, %v1353_v17 }
 0x8d6   : > { %v1362_v63 = vpack.c.bf16 %v1361_v62, %v1361_v62 }
 0x8d8   : > { %1956 = vmatmul.mubr.msk.bf16.vlgmr.msra.gmra.mxu1 %vm1402_vm6, %v1362_v63 }
 0x998   : > { %v1440_v1 = vpop.f32.mrf.mxu1 }
 0x999   : > { %v1441_v2 = vadd.f32 %v1849_v0, %v1440_v1 }
 0x99a   : > { %v1957_v3 = vpop.f32.mrf.mxu1 }
 0x99b   : > { %v1446_v4 = vadd.f32 %v1441_v2, %v1285_v43 }
 0x99c   : > { %v1443_v5 = vpop.f32.mrf.mxu1 }
 0x99d   : > { %v1449_v6 = vsel %vm906_vm2, %v1446_v4, 0.0 }
 0x99e   : > { %1450 = vadd.xlane.f32.xlu0 %v1449_v6  ;;  %v1958_v7 = vpop.f32.mrf.mxu1 }
 0xa27   : > { %v1451_v8 = vpop.xlane.xlu0 %1450 }
 0xa28   : > { %v1452_v9 = vmul.f32 0.03125, %v1451_v8 }
 0xa2a   : > { %v1453_v10 = vsub.f32 %v1446_v4, %v1452_v9 }
 0xa2c   : > { %v1454_v11 = vmul.f32 %v1453_v10, %v1453_v10 }
 0xa2e   : > { %v1455_v12 = vsel %vm906_vm2, %v1454_v11, 0.0 }
 0xa2f   : > { %1456 = vadd.xlane.f32.xlu0 %v1455_v12 }
 0xab8   : > { %v1457_v13 = vpop.xlane.xlu0 %1456 }
 0xab9   : > { %v1458_v14 = vmul.f32 0.03125, %v1457_v13 }
 0xabb   : > { %v1459_v15 = vadd.f32 1e-12, %v1458_v14 }
 0xabd   : > { %2080 = vrsqrt.f32 %v1459_v15 }
 0xaca   : > { %v2081_v16 = vpop.eup %2080 }
 0xacb   : > { %v1461_v20 = vmul.f32 %v2081_v16, %v1453_v10 }
 0xacd   : > { %v1468_v22 = vmul.f32 %v1855_v18, %v1461_v20  ;;  %1480 = sbr.rel (%p1857_p1) target bundleno = 3189 (0xc75), region = 108 }
 0xacf   : > { %v1475_v23 = vadd.f32 %v1856_v21, %v1468_v22 }
 0xad1   : > { %1476 = vst.msk [vmem:[#allocation2] sm:$0xff] %vm906_vm2, %v1475_v23 }
 0xad2   : > { %v2082_v24 = vld [vmem:[%s2718_s17 + $0x8] sm:$0xff]   ;;  %v2190_v25 = vmov 0.0   ;;  %v2083_v26 = vld [vmem:[%s2718_s17] sm:$0xff]   ;;  %vm2191_vm7 = vmmov 0   ;;  %v1481_v27 = vpack.c.bf16 %v1475_v23, %v1475_v23 }
 0xad3   : > { %1959 = vmatprep.subr.bf16.mxu0 %v2190_v25  ;;  %1967 = vmatprep.subr.bf16.mxu1 %v2190_v25  ;;  %v2084_v28 = vld [vmem:[%s2719_s1 + $0x8] sm:$0xff]   ;;  %v2085_v29 = vld [vmem:[%s2720_s4] sm:$0xff]  }
 0xad4   : > { %1960 = vmatpush3.bf16.msra.mxu0 %v2082_v24  ;;  %1963 = vmatprep.mubr.msk.bf16.mxu0 %vm2191_vm7, %v2190_v25  ;;  %v1486_v30 = vld [vmem:[%s2721_s16] sm:$0x1] }
 0xad5   : > { %1961 = vmatprep.subr.bf16.mxu0 %v2190_v25  ;;  %1971 = vmatprep.mubr.msk.bf16.mxu1 %vm2191_vm7, %v2190_v25  ;;  %v1548_v37 = vld [vmem:[%s2722_s23] sm:$0x1] }
 0xad6   : > { %1968 = vmatpush3.bf16.msra.mxu1 %v2084_v28 }
 0xad7   : > { %1969 = vmatprep.subr.bf16.mxu1 %v2190_v25 }
 0xad8   : > { %1962 = vmatpush3.bf16.msra.mxu0 %v2083_v26 }
 0xada   : > { %1970 = vmatpush3.bf16.msra.mxu1 %v2085_v29 }
 0xadb   : > { %1964 = vmatmul.mubr.msk.bf16.vlgmr.msra.gmra.mxu0 %vm906_vm2, %v1481_v27 }
 0xb9b   : > { %v1536_v31 = vpop.f32.mrf.mxu0 }
 0xb9c   : > { %v1537_v32 = vadd.f32 %v1536_v31, %v1486_v30 }
 0xb9d   : > { %v1965_v33 = vpop.f32.mrf.mxu0 }
 0xb9e   : > { %2086 = vtanh.f32 %v1537_v32 }
 0xb9f   : > { %v1539_v34 = vpop.f32.mrf.mxu0 }
 0xba1   : > { %v1966_v35 = vpop.f32.mrf.mxu0 }
 0xbab   : > { %v2087_v19 = vpop.eup %2086 }
 0xbac   : > { %v1543_v36 = vpack.c.bf16 %v2087_v19, %v2087_v19 }
 0xbae   : > { %1972 = vmatmul.mubr.msk.bf16.vlgmr.msra.gmra.mxu1 %vm906_vm2, %v1543_v36 }
 0xc6e   : > { %v1598_v38 = vpop.f32.mrf.mxu1 }
 0xc6f   : > { %v1599_v39 = vadd.f32 %v1598_v38, %v1548_v37 }
 0xc70   : > { %v1973_v40 = vpop.f32.mrf.mxu1 }
 0xc71   : > { %1604 = vst [vmem:[%s2440_s15] sm:$0x1] %v1599_v39 }
 0xc72   : > { %v1601_v41 = vpop.f32.mrf.mxu1 }
 0xc74   : > { %v1974_v42 = vpop.f32.mrf.mxu1 }
 0xc75 PF: > { %s2723_s6 = sld [smem:[#allocation9_spill]]  ;;  %s1618_s3 = sshll.u32 %s2440_s15, 4  ;;  %s1619_s3 = int_to_ptr.vmem [resolvable:$true] %s1618_s3 }
 0xc76   : > { %s2725_s26 = sld [smem:[#allocation32_spill]]  ;;  %s2727_s27 = sand.u32 1, %s2156_s22  }
 0xc77   : > { %s1606_s9 = scalar_lea.sflag [#allocation4], %s2727_s27  ;;  %s2088_s0 = scalar_lea.vmem %s1619_s3, 16 }
 0xc78   : > { %p2089_p2 = scmp.ne.s32.totalorder %s1619_s3, %s2088_s0  ;;  %s2192_s1 = smov [#allocation3]  }
 0xc79   : > { %s2092_s18 = sshll.u32 %s2192_s1, 4  ;;  %s2093_s18 = int_to_ptr.vmem [resolvable:$false] %s2092_s18 }
 0xc7a   : > { %p2090_p4 = pnand %p2089_p2, %p2347_p3  ;;  %s2094_s2 = scalar_lea.vmem %s2093_s18, 32 }
 0xc7b   : > { %s1864_s10 = sshll.u32 %s2723_s6, 4  ;;  %p2095_p6 = scmp.lt.s32.totalorder %s1619_s3, %s2093_s18 }
 0xc7c   : > { %s2726_s30 = smov %s2725_s26  ;;  %s1616_s29 = scalar_lea.hbm %s2725_s26, %s1864_s10 }
 0xc7d   : > { %p2091_p5 = pneg %p2090_p4  ;;  %p2096_p7 = scmp.lt.s32.totalorder %s2094_s2, %s2088_s0 }
 0xc7f   : > { %p2097_p8 = por %p2096_p7, %p2095_p6 }
 0xc81   : > { %p2098_p10 = pnand %p2097_p8, %p2091_p5 }
 0xc83   : > { %2101 = shalt.err (!%p2098_p10)
}
 0xc84   : > { %s2102_s19 = scalar_lea.hbm %s1616_s29, 16  ;;  %s2106_s16 = scalar_lea.hbm %s2726_s30, 32 }
 0xc85   : > { %p2103_p11 = scmp.ne.s32.totalorder %s1616_s29, %s2102_s19  ;;  %p2107_p0 = scmp.lt.s32.totalorder %s1616_s29, %s2726_s30 }
 0xc86   : > { %p2108_p1 = scmp.lt.s32.totalorder %s2106_s16, %s2102_s19 }
 0xc87   : > { %p2104_p12 = pnand %p2103_p11, %p2347_p3 }
 0xc88   : > { %p2109_p2 = por %p2108_p1, %p2107_p0 }
 0xc89   : > { %p2105_p13 = pneg %p2104_p12 }
 0xc8b   : > { %p2110_p4 = pnand %p2109_p2, %p2105_p13 }
 0xc8d   : > { %2113 = shalt.err (!%p2110_p4)
}
 0xc8e   : > { %1975 = dma.vmem_to_hbm [thread:$0]  (%p2347_p3), %s1619_s3, 16, %s1616_s29, %s1606_s9  }
 0xc8f PF: > { %s2728_s23 = sld [smem:[#allocation12_spill]] }
 0xc90   : > { %s2729_s6 = sld [smem:[#allocation6_spill]] }
 0xc95   : > { %p1981_p5 = scmp.ge.s32.totalorder %s2728_s23, 2 }
 0xc96   : > { %s1630_s24 = sand.u32 1, %s2729_s6  }
 0xc97   : > { %p1978_p6 = pnand %p1981_p5, %p2357_p9  ;;  %s1631_s28 = scalar_lea.sflag [#allocation4], %s1630_s24 }
 0xc99   : > { %p1979_p7 = pneg %p1978_p6 }
 0xc9b   : > { %2147 = dma.done.wait (%p1979_p7), %s1631_s28, 16  }
 0xc9c   : > { %2149 = vsyncadd (%p1979_p7), %s1631_s28, 4294967280  ;;  %s33_s26 = sadd.s32 1, %s2728_s23   ;;  %s2731_s27 = sld [smem:[#allocation7_spill]] }
 0xc9d   : > { %p30_p8 = scmp.ge.s32.totalorder %s33_s26, 6   ;;  %s2732_s23 = sld [smem:[#allocation17_spill]] }
 0xc9e   : > { %s2733_s24 = sld [smem:[#allocation10_spill]]  ;;  %s2737_s1 = smov %s2156_s22 }
 0xc9f   : > { %s2734_s2 = sld [smem:[#allocation11_spill]]  ;;  %32 = sbr.rel (!%p30_p8) target bundleno = 21 (0x15), region = 182 }
 0xca0   : > { %s2735_s25 = sld [smem:[#allocation13_spill]] }
 0xca1   : > { %s2736_s3 = sld [smem:[#allocation15_spill]] }
 0xca2   : > { %s2738_s22 = smov %s2731_s27 }
 0xca4   :  { %1635 = vsyncpa [#allocation4], 1 }
 0xca5   :  { %1637 = vsyncpa [#allocation4 + $0x1], 1 }

</bundles_post_ra>
